<compile_context>
chip_gen: v7x
topology: tpu7x:2x2x1
jax: 0.10.0
libtpu: 0.0.40
codegen_flags: <defaults>
</compile_context>

<pallas_src>
import jax
import jax.numpy as jnp
from jax.experimental import pallas as pl
from jax.experimental.pallas import tpu as pltpu


def _attention_kernel(hid_ref, enc_ref, img_ref, wh_ref, we_ref, b_ref, v_ref, o_ref):
    # hid_ref: (Bblk, Dd)      bf16  decoder hidden states for this batch block
    # enc_ref: (S, Bblk, E2)   bf16  encoder outputs, natural src-major layout
    # img_ref: (Bblk, E2)      bf16  image features
    # wh_ref:  (Dd, Dd)        bf16  attn weight rows that multiply `hidden`
    # we_ref:  (E2, Dd)        bf16  attn weight rows that multiply enc_out (+img)
    # b_ref:   (1, Dd)         f32   attn bias
    # v_ref:   (1, Dd)         f32   v weight (no bias)
    # o_ref:   (Bblk, S)       f32   softmax attention weights (lane-dense)
    S, Bblk, E2 = enc_ref.shape
    Dd = hid_ref.shape[1]

    # Per-batch bias term, computed ONCE per block. Folding img @ W_enc in here
    # (linearity of the matmul) removes the (S, Bblk, E2) broadcast-add entirely.
    base = (
        jnp.dot(hid_ref[...], wh_ref[...], preferred_element_type=jnp.float32)
        + jnp.dot(img_ref[...], we_ref[...], preferred_element_type=jnp.float32)
        + b_ref[...]
    )  # (Bblk, Dd) f32

    # Big MXU matmul straight off the pipelined encoder buffer (bf16 in, f32 acc).
    # The reshape only collapses the leading (sublane-major) dims; lane axis (E2)
    # is untouched.
    enc_proj = jnp.dot(
        enc_ref[...].reshape(S * Bblk, E2), we_ref[...],
        preferred_element_type=jnp.float32,
    ).reshape(S, Bblk, Dd)

    energy = jnp.tanh(enc_proj + base[None, :, :])                   # (S, Bblk, Dd) f32

    # v projection: contract the lane (Dd) axis.
    att_sb = jnp.sum(energy * v_ref[...][None, :, :], axis=2)        # (S, Bblk)

    # Re-orient the tiny score tile so softmax reduces along lanes and the
    # output store is a dense (Bblk, S) tile.
    att = att_sb.T                                                   # (Bblk, S)
    m = jnp.max(att, axis=1, keepdims=True)
    e = jnp.exp(att - m)
    inv = pl.reciprocal(jnp.sum(e, axis=1, keepdims=True), approx=True)  # EUP slot
    o_ref[...] = e * inv


def _vmem_capacity_bytes():
    """Physical VMEM of the local TPU generation (fallback: v7x-safe 64 MiB)."""
    try:
        cap = int(pltpu.get_tpu_info().vmem_capacity_bytes)
        if cap > 0:
            return cap
    except Exception:
        pass
    return 64 << 20


def _block_vmem_bytes(Bblk, S, E2, Dd):
    """Honest per-step VMEM footprint for a batch block of size Bblk."""
    enc = S * Bblk * E2 * 2 * 2            # bf16 encoder block, double-buffered
    out = Bblk * S * 4 * 2                 # f32 output tile, double-buffered
    tmp = S * Bblk * Dd * 4 * 2            # enc_proj + energy f32 live values
    small = (Bblk * Dd + Bblk * E2) * 2 * 2        # hidden + img blocks (x2 buffers)
    weights = (Dd * Dd + E2 * Dd) * 2 * 2 + 2 * Dd * 4 * 2  # W_hid/W_enc/bias/v
    return enc + out + tmp + small + weights


def _divisor_candidates(B):
    """Divisors of B that satisfy the sublane rule (multiple of 8, or B itself),
    in descending order."""
    cands = [B]
    for c in range(B - 1, 0, -1):
        if B % c == 0 and c % 8 == 0:
            cands.append(c)
    return cands


def _pick_batch_block(B, S, E2, Dd, target_rows=512):
    """Pick Bblk and a matching vmem_limit_bytes.

    Prefers the whole batch (contiguous DMA runs when E2 < 128) as long as it
    fits the per-generation VMEM budget, but keeps >=2 grid steps on large
    batches so the "parallel" grid axis can be sharded across v7x's 2 cores.
    """
    phys = _vmem_capacity_bytes()
    budget = max(4 << 20, int(phys * 0.45))

    cands = _divisor_candidates(B)
    feasible = [c for c in cands if _block_vmem_bytes(c, S, E2, Dd) <= budget]
    if not feasible:
        feasible = [cands[-1]]             # smallest candidate; best effort
    Bblk = feasible[0]                     # largest feasible -> contiguous DMA

    # v7x megacore: prefer >=2 grid steps when the batch can be split into
    # >=8-row blocks without starving the MXU of rows.
    if B // Bblk < 2:
        for c in feasible[1:]:
            if c % 8 == 0 and c * S >= min(target_rows, (B * S) // 2):
                Bblk = c
                break

    need = _block_vmem_bytes(Bblk, S, E2, Dd)
    vmem_limit = int(min(phys, max(32 << 20, need * 2)))
    return Bblk, vmem_limit


def attention_forward(hidden, encoder_outputs, image_features, w_attn, b_attn, v_w):
    """hidden: [B, Dd]; encoder_outputs: [S, B, E2]; image_features: [B, E2].
    w_attn: [Dd+E2, Dd] (in x out, cat order = [hidden, enc+img]),
    b_attn: [Dd], v_w: [Dd].  Returns softmax attention weights: [B, S] (f32)."""
    S, B, E2 = encoder_outputs.shape
    Dd = hidden.shape[1]

    # Split the concat weight (tiny, one-time) so the kernel never concatenates;
    # cast the MXU operands to bf16 (f32 accumulation inside the kernel).
    w_hid = w_attn[:Dd, :].astype(jnp.bfloat16)      # (Dd, Dd)
    w_enc = w_attn[Dd:, :].astype(jnp.bfloat16)      # (E2, Dd)
    b2 = b_attn.reshape(1, Dd).astype(jnp.float32)
    v2 = v_w.reshape(1, Dd).astype(jnp.float32)

    hid_bf = hidden.astype(jnp.bfloat16)
    enc_bf = encoder_outputs.astype(jnp.bfloat16)    # halves the dominant HBM bytes
    img_bf = image_features.astype(jnp.bfloat16)

    Bblk, vmem_limit = _pick_batch_block(B, S, E2, Dd)
    assert B % Bblk == 0, (B, Bblk)                  # guard: no dropped batches
    steps = B // Bblk

    # Advisory cost estimate for XLA's scheduler around the custom call.
    flops = 2 * B * S * E2 * Dd + 2 * B * (E2 + Dd) * Dd + 2 * B * S * Dd
    transcendentals = B * S * Dd + B * S + B                     # tanh + exp + rcp
    bytes_accessed = (
        B * S * E2 * 2 + B * (Dd + E2) * 2                       # bf16 inputs
        + ((Dd + E2) * Dd * 2 + 2 * Dd * 4) * steps              # weights per step
        + B * S * 4                                              # f32 output
    )

    out = pl.pallas_call(
        _attention_kernel,
        out_shape=jax.ShapeDtypeStruct((B, S), jnp.float32),
        grid_spec=pltpu.PrefetchScalarGridSpec(
            num_scalar_prefetch=0,
            grid=(steps,),
            in_specs=[
                pl.BlockSpec((Bblk, Dd), lambda b: (b, 0)),        # hidden
                pl.BlockSpec((S, Bblk, E2), lambda b: (0, b, 0)),  # encoder_outputs
                pl.BlockSpec((Bblk, E2), lambda b: (b, 0)),        # image_features
                pl.BlockSpec((Dd, Dd), lambda b: (0, 0)),          # W_hid
                pl.BlockSpec((E2, Dd), lambda b: (0, 0)),          # W_enc
                pl.BlockSpec((1, Dd), lambda b: (0, 0)),           # bias
                pl.BlockSpec((1, Dd), lambda b: (0, 0)),           # v
            ],
            out_specs=pl.BlockSpec((Bblk, S), lambda b: (b, 0)),   # lane-dense output
        ),
        compiler_params=pltpu.CompilerParams(
            dimension_semantics=("parallel",),   # shard batch blocks across cores
            vmem_limit_bytes=vmem_limit,
        ),
        cost_estimate=pl.CostEstimate(
            flops=flops,
            transcendentals=transcendentals,
            bytes_accessed=bytes_accessed,
        ),
    )(hid_bf, enc_bf, img_bf, w_hid, w_enc, b2, v2)

    return out   # [B, S]


def _reference(hidden, encoder_outputs, image_features, w_attn, b_attn, v_w):
    S, B, E2 = encoder_outputs.shape
    hid = jnp.repeat(hidden[:, None, :], S, axis=1)                     # [B,S,Dd]
    eo = jnp.transpose(encoder_outputs, (1, 0, 2)) + image_features[:, None, :]
    cat = jnp.concatenate([hid, eo], axis=2)                            # [B,S,Dd+E2]
    energy = jnp.tanh(cat @ w_attn + b_attn)                            # [B,S,Dd]
    att = jnp.einsum("bsd,d->bs", energy, v_w)                          # [B,S]
    return jax.nn.softmax(att, axis=1)


if __name__ == "__main__":
    # Small shapes consistent with the module's forward.
    enc_hid_dim = 16
    dec_hid_dim = 32
    src_len = 8
    batch = 2
    E2 = enc_hid_dim * 2

    key = jax.random.PRNGKey(0)
    k1, k2, k3, k4, k5, k6 = jax.random.split(key, 6)

    # Deterministic parameter init (shapes per nn.Linear definitions).
    in_dim = E2 + dec_hid_dim
    bound_attn = 1.0 / (in_dim ** 0.5)
    w_attn = jax.random.uniform(k1, (in_dim, dec_hid_dim), jnp.float32,
                                -bound_attn, bound_attn)   # in x out
    b_attn = jax.random.uniform(k2, (dec_hid_dim,), jnp.float32,
                                -bound_attn, bound_attn)
    bound_v = 1.0 / (dec_hid_dim ** 0.5)
    v_w = jax.random.uniform(k3, (dec_hid_dim,), jnp.float32, -bound_v, bound_v)

    # Inputs.
    hidden = jax.random.normal(k4, (batch, dec_hid_dim), jnp.float32)
    encoder_outputs = jax.random.normal(k5, (src_len, batch, E2), jnp.float32)
    image_features = jax.random.normal(k6, (batch, E2), jnp.float32)

    out = attention_forward(hidden, encoder_outputs, image_features,
                            w_attn, b_attn, v_w)
    out = jax.block_until_ready(out)

    ref = _reference(hidden, encoder_outputs, image_features, w_attn, b_attn, v_w)
    assert out.shape == (batch, src_len)
    # Tolerance accounts for bf16 MXU operands (f32 accumulation) and the EUP
    # approx reciprocal in the softmax denominator.
    assert jnp.allclose(out, ref, atol=5e-3, rtol=1e-2), (out, ref)
    assert jnp.allclose(jnp.sum(out, axis=1), 1.0, atol=3e-3)

    print("KERNEL_OK")
</pallas_src>

<mosaic_0001>
module attributes {stable_mosaic.version = 11 : i64} {
  func.func @_attention_kernel(%arg0: i32, %arg1: memref<2x32xbf16, #tpu.memory_space<vmem>>, %arg2: memref<8x2x32xbf16, #tpu.memory_space<vmem>>, %arg3: memref<2x32xbf16, #tpu.memory_space<vmem>>, %arg4: memref<32x32xbf16, #tpu.memory_space<vmem>>, %arg5: memref<32x32xbf16, #tpu.memory_space<vmem>>, %arg6: memref<1x32xf32, #tpu.memory_space<vmem>>, %arg7: memref<1x32xf32, #tpu.memory_space<vmem>>, %arg8: memref<2x8xf32, #tpu.memory_space<vmem>>) attributes {dimension_semantics = [#tpu.dimension_semantics<parallel>], iteration_bounds = array<i64: 1>, scalar_prefetch = 0 : i64, scratch_operands = 0 : i64, tpu.core_type = #tpu.core_type<tc>, window_params = [{transform_indices = @transform_0, window_bounds = array<i64: 2, 32>}, {transform_indices = @transform_1, window_bounds = array<i64: 8, 2, 32>}, {transform_indices = @transform_2, window_bounds = array<i64: 2, 32>}, {pipeline_mode = #tpu.pipeline_mode<synchronous>, transform_indices = @transform_3, window_bounds = array<i64: 32, 32>}, {pipeline_mode = #tpu.pipeline_mode<synchronous>, transform_indices = @transform_4, window_bounds = array<i64: 32, 32>}, {pipeline_mode = #tpu.pipeline_mode<synchronous>, transform_indices = @transform_5, window_bounds = array<i64: 1, 32>}, {pipeline_mode = #tpu.pipeline_mode<synchronous>, transform_indices = @transform_6, window_bounds = array<i64: 1, 32>}, {transform_indices = @transform_7, window_bounds = array<i64: 2, 8>}]} {
    %c0 = arith.constant 0 : index
    %c0_0 = arith.constant 0 : index
    %0 = vector.load %arg1[%c0, %c0_0] : memref<2x32xbf16, #tpu.memory_space<vmem>>, vector<2x32xbf16>
    %c0_1 = arith.constant 0 : index
    %c0_2 = arith.constant 0 : index
    %1 = vector.load %arg4[%c0_1, %c0_2] : memref<32x32xbf16, #tpu.memory_space<vmem>>, vector<32x32xbf16>
    %cst = arith.constant dense<0.000000e+00> : vector<2x32xf32>
    %2 = tpu.matmul %0, %1, %cst {dimension_numbers = #tpu.dot_dimension_numbers<[1], [0], [0], [1], [0, 0, 1, 1], [], []>} : vector<2x32xbf16>, vector<32x32xbf16>, vector<2x32xf32> -> vector<2x32xf32>
    %c0_3 = arith.constant 0 : index
    %c0_4 = arith.constant 0 : index
    %3 = vector.load %arg3[%c0_3, %c0_4] : memref<2x32xbf16, #tpu.memory_space<vmem>>, vector<2x32xbf16>
    %c0_5 = arith.constant 0 : index
    %c0_6 = arith.constant 0 : index
    %4 = vector.load %arg5[%c0_5, %c0_6] : memref<32x32xbf16, #tpu.memory_space<vmem>>, vector<32x32xbf16>
    %cst_7 = arith.constant dense<0.000000e+00> : vector<2x32xf32>
    %5 = tpu.matmul %3, %4, %cst_7 {dimension_numbers = #tpu.dot_dimension_numbers<[1], [0], [0], [1], [0, 0, 1, 1], [], []>} : vector<2x32xbf16>, vector<32x32xbf16>, vector<2x32xf32> -> vector<2x32xf32>
    %6 = arith.addf %2, %5 : vector<2x32xf32>
    %c0_8 = arith.constant 0 : index
    %c0_9 = arith.constant 0 : index
    %7 = vector.load %arg6[%c0_8, %c0_9] : memref<1x32xf32, #tpu.memory_space<vmem>>, vector<1x32xf32>
    %8 = vector.broadcast %7 : vector<1x32xf32> to vector<2x32xf32>
    %9 = arith.addf %6, %8 : vector<2x32xf32>
    %c0_10 = arith.constant 0 : index
    %c0_11 = arith.constant 0 : index
    %c0_12 = arith.constant 0 : index
    %10 = vector.load %arg2[%c0_10, %c0_11, %c0_12] : memref<8x2x32xbf16, #tpu.memory_space<vmem>>, vector<8x2x32xbf16>
    %11 = vector.shape_cast %10 : vector<8x2x32xbf16> to vector<16x32xbf16>
    %c0_13 = arith.constant 0 : index
    %c0_14 = arith.constant 0 : index
    %12 = vector.load %arg5[%c0_13, %c0_14] : memref<32x32xbf16, #tpu.memory_space<vmem>>, vector<32x32xbf16>
    %cst_15 = arith.constant dense<0.000000e+00> : vector<16x32xf32>
    %13 = tpu.matmul %11, %12, %cst_15 {dimension_numbers = #tpu.dot_dimension_numbers<[1], [0], [0], [1], [0, 0, 1, 1], [], []>} : vector<16x32xbf16>, vector<32x32xbf16>, vector<16x32xf32> -> vector<16x32xf32>
    %14 = vector.shape_cast %13 : vector<16x32xf32> to vector<8x2x32xf32>
    %15 = vector.shape_cast %9 : vector<2x32xf32> to vector<1x2x32xf32>
    %16 = vector.broadcast %15 : vector<1x2x32xf32> to vector<8x2x32xf32>
    %17 = arith.addf %14, %16 : vector<8x2x32xf32>
    %18 = math.tanh %17 : vector<8x2x32xf32>
    %c0_16 = arith.constant 0 : index
    %c0_17 = arith.constant 0 : index
    %19 = vector.load %arg7[%c0_16, %c0_17] : memref<1x32xf32, #tpu.memory_space<vmem>>, vector<1x32xf32>
    %20 = vector.shape_cast %19 : vector<1x32xf32> to vector<1x1x32xf32>
    %21 = vector.broadcast %20 : vector<1x1x32xf32> to vector<8x2x32xf32>
    %22 = arith.mulf %18, %21 : vector<8x2x32xf32>
    %cst_18 = arith.constant dense<0.000000e+00> : vector<8x2xf32>
    %23 = vector.multi_reduction <add>, %22, %cst_18 [2] : vector<8x2x32xf32> to vector<8x2xf32>
    %24 = tpu.transpose %23, [1, 0] : vector<8x2xf32> -> vector<2x8xf32>
    %cst_19 = arith.constant dense<0xFF800000> : vector<2xf32>
    %25 = vector.multi_reduction <maximumf>, %24, %cst_19 [1] : vector<2x8xf32> to vector<2xf32>
    %26 = vector.shape_cast %25 : vector<2xf32> to vector<2x1xf32>
    %27 = vector.broadcast %26 : vector<2x1xf32> to vector<2x8xf32>
    %28 = arith.subf %24, %27 : vector<2x8xf32>
    %29 = math.exp %28 : vector<2x8xf32>
    %cst_20 = arith.constant dense<0.000000e+00> : vector<2xf32>
    %30 = vector.multi_reduction <add>, %29, %cst_20 [1] : vector<2x8xf32> to vector<2xf32>
    %31 = vector.shape_cast %30 : vector<2xf32> to vector<2x1xf32>
    %32 = tpu.reciprocal %31 {approx = true} : vector<2x1xf32> -> vector<2x1xf32>
    %33 = vector.broadcast %32 : vector<2x1xf32> to vector<2x8xf32>
    %34 = arith.mulf %29, %33 : vector<2x8xf32>
    %c0_21 = arith.constant 0 : index
    %c0_22 = arith.constant 0 : index
    %35 = vector.load %arg8[%c0_21, %c0_22] : memref<2x8xf32, #tpu.memory_space<vmem>>, vector<2x8xf32>
    tpu.vector_store %arg8[%c0_21, %c0_22], %34 {strides = array<i32>} : memref<2x8xf32, #tpu.memory_space<vmem>>, vector<2x8xf32>,
    return
  }
  func.func @transform_0(%arg0: i32) -> (i32, i32) {
    %c0_i32 = arith.constant 0 : i32
    %c0_i32_0 = arith.constant 0 : i32
    return %arg0, %c0_i32 : i32, i32
  }
  func.func @transform_1(%arg0: i32) -> (i32, i32, i32) {
    %c0_i32 = arith.constant 0 : i32
    %c0_i32_0 = arith.constant 0 : i32
    %c0_i32_1 = arith.constant 0 : i32
    return %c0_i32, %arg0, %c0_i32_0 : i32, i32, i32
  }
  func.func @transform_2(%arg0: i32) -> (i32, i32) {
    %c0_i32 = arith.constant 0 : i32
    %c0_i32_0 = arith.constant 0 : i32
    return %arg0, %c0_i32 : i32, i32
  }
  func.func @transform_3(%arg0: i32) -> (i32, i32) {
    %c0_i32 = arith.constant 0 : i32
    %c0_i32_0 = arith.constant 0 : i32
    %c0_i32_1 = arith.constant 0 : i32
    return %c0_i32, %c0_i32_0 : i32, i32
  }
  func.func @transform_4(%arg0: i32) -> (i32, i32) {
    %c0_i32 = arith.constant 0 : i32
    %c0_i32_0 = arith.constant 0 : i32
    %c0_i32_1 = arith.constant 0 : i32
    return %c0_i32, %c0_i32_0 : i32, i32
  }
  func.func @transform_5(%arg0: i32) -> (i32, i32) {
    %c0_i32 = arith.constant 0 : i32
    %c0_i32_0 = arith.constant 0 : i32
    %c0_i32_1 = arith.constant 0 : i32
    return %c0_i32, %c0_i32_0 : i32, i32
  }
  func.func @transform_6(%arg0: i32) -> (i32, i32) {
    %c0_i32 = arith.constant 0 : i32
    %c0_i32_0 = arith.constant 0 : i32
    %c0_i32_1 = arith.constant 0 : i32
    return %c0_i32, %c0_i32_0 : i32, i32
  }
  func.func @transform_7(%arg0: i32) -> (i32, i32) {
    %c0_i32 = arith.constant 0 : i32
    %c0_i32_0 = arith.constant 0 : i32
    return %arg0, %c0_i32 : i32, i32
  }
}

</mosaic_0001>

<bundles_post_ra>
// kernel: tpu_custom_call.1
= control target key start
LH: loop header
LB: loop body
LE: loop exit
PB: predicated region body
PF: predicated region fallthrough
CT: control target
= control target key end

     0   :  { %12 = vsyncpa [#allocation3], 0  ;;  %s881_s0 = inlined_call_operand.hbm [shape: bf16[2,32], index: 0, kind: input, shape index: {}]   ;;  %s882_s1 = inlined_call_operand.hbm [shape: bf16[8,2,32], index: 1, kind: input, shape index: {}]   ;;  %s883_s2 = inlined_call_operand.vmem [shape: bf16[2,32], index: 2, kind: input, shape index: {}]   ;;  %s884_s3 = inlined_call_operand.hbm [shape: bf16[32,32], index: 3, kind: input, shape index: {}]   ;;  %s885_s4 = inlined_call_operand.hbm [shape: bf16[32,32], index: 4, kind: input, shape index: {}]   ;;  %s886_s5 = inlined_call_operand.vmem [shape: f32[1,32], index: 5, kind: input, shape index: {}]   ;;  %s887_s6 = inlined_call_operand.vmem [shape: f32[1,32], index: 6, kind: input, shape index: {}]   ;;  %s888_s7 = inlined_call_operand.hbm [shape: f32[2,8], index: 7, kind: output, shape index: {}]  }
   0x1   :  { %13 = vsyncpa [#allocation6], 0 }
   0x2   :  { %14 = vsyncpa [#allocation9], 0 }
   0x3   :  { %15 = vsyncpa [#allocation4], 0  ;;  %s735_s24 = smov [#allocation5]   ;;  %s617_s28 = scalar_lea.hbm %s882_s1, 128 }
   0x4   :  { %s31_s25 = sshll.u32 %s735_s24, 4  ;;  %p618_p0 = scmp.ne.s32.totalorder %s882_s1, %s617_s28  ;;  %s32_s25 = int_to_ptr.vmem [resolvable:$true] %s31_s25 }
   0x5   :  { %p621_p1 = scmp.lt.u32.totalorder %s617_s28, %s882_s1 }
   0x7   :  { %p623_p2 = pnand %p621_p1, %p618_p0 }
   0x9   :  { %626 = shalt.err (!%p623_p2)
}
   0xa   :  { %s627_s10 = scalar_lea.vmem %s32_s25, 128  ;;  %p632_p4 = scmp.lt.s32.totalorder %s32_s25, %s32_s25 }
   0xb   :  { %p628_p3 = scmp.ne.s32.totalorder %s32_s25, %s627_s10  ;;  %p633_p5 = scmp.lt.s32.totalorder %s627_s10, %s627_s10 }
   0xd   :  { %p634_p6 = por %p633_p5, %p632_p4 }
   0xf   :  { %p635_p7 = pnand %p634_p6, %p628_p3 }
  0x11   :  { %638 = shalt.err (!%p635_p7)
}
  0x12   :  { %s736_s11 = smov 16   ;;  %s737_s12 = smov 1  }
  0x13   :  { %37 = dma.hbm_to_vmem [thread:$0]  %s882_s1, 128, %s32_s25, [#allocation6], %s736_s11, %s736_s11, %s737_s12  }
  0x14   :  { %s738_s15 = smov [#allocation2]   ;;  %s739_s17 = smov [#allocation7]  }
  0x15   :  { %s22_s16 = sshll.u32 %s738_s15, 4  ;;  %s45_s18 = sshll.u32 %s739_s17, 4  ;;  %s23_s16 = int_to_ptr.vmem [resolvable:$true] %s22_s16  ;;  %s46_s18 = int_to_ptr.vmem [resolvable:$true] %s45_s18 }
  0x16   :  { %s639_s21 = scalar_lea.hbm %s881_s0, 16 }
  0x17   :  { %p640_p8 = scmp.ne.s32.totalorder %s881_s0, %s639_s21  ;;  %p643_p9 = scmp.lt.u32.totalorder %s639_s21, %s881_s0 }
  0x19   :  { %p645_p10 = pnand %p643_p9, %p640_p8 }
  0x1b   :  { %648 = shalt.err (!%p645_p10)
}
  0x1c   :  { %s649_s1 = scalar_lea.vmem %s23_s16, 16  ;;  %s653_s25 = scalar_lea.vmem %s23_s16, 32 }
  0x1d   :  { %p650_p11 = scmp.ne.s32.totalorder %s23_s16, %s649_s1  ;;  %p654_p12 = scmp.lt.s32.totalorder %s23_s16, %s23_s16 }
  0x1e   :  { %p655_p13 = scmp.lt.s32.totalorder %s653_s25, %s649_s1 }
  0x20   :  { %p656_p0 = por %p655_p13, %p654_p12 }
  0x22   :  { %p657_p1 = pnand %p656_p0, %p650_p11 }
  0x24   :  { %660 = shalt.err (!%p657_p1)
}
  0x25   :  { %25 = dma.hbm_to_vmem [thread:$0]  %s881_s0, 16, %s23_s16, [#allocation3]  }
  0x26   :  { %s661_s8 = scalar_lea.hbm %s884_s3, 256 }
  0x27   :  { %p662_p2 = scmp.ne.s32.totalorder %s884_s3, %s661_s8  ;;  %p665_p3 = scmp.lt.u32.totalorder %s661_s8, %s884_s3 }
  0x29   :  { %p667_p4 = pnand %p665_p3, %p662_p2 }
  0x2b   :  { %670 = shalt.err (!%p667_p4)
}
  0x2c   :  { %s671_s13 = scalar_lea.vmem %s46_s18, 256  ;;  %p676_p6 = scmp.lt.s32.totalorder %s46_s18, %s46_s18 }
  0x2d   :  { %p672_p5 = scmp.ne.s32.totalorder %s46_s18, %s671_s13  ;;  %p677_p7 = scmp.lt.s32.totalorder %s671_s13, %s671_s13 }
  0x2f   :  { %p678_p8 = por %p677_p7, %p676_p6 }
  0x31   :  { %p679_p9 = pnand %p678_p8, %p672_p5 }
  0x33   :  { %682 = shalt.err (!%p679_p9)
}
  0x34   :  { %s740_s0 = smov 64   ;;  %s741_s14 = smov 4  }
  0x35   :  { %51 = dma.hbm_to_vmem [thread:$0]  %s884_s3, 256, %s46_s18, [#allocation6], %s740_s0, %s740_s0, %s741_s14  }
  0x36   :  { %s742_s17 = smov [#allocation8]   ;;  %s683_s22 = scalar_lea.hbm %s885_s4, 256 }
  0x37   :  { %s57_s19 = sshll.u32 %s742_s17, 4  ;;  %p684_p10 = scmp.ne.s32.totalorder %s885_s4, %s683_s22  ;;  %s58_s19 = int_to_ptr.vmem [resolvable:$true] %s57_s19 }
  0x38   :  { %p687_p11 = scmp.lt.u32.totalorder %s683_s22, %s885_s4 }
  0x3a   :  { %p689_p12 = pnand %p687_p11, %p684_p10 }
  0x3c   :  { %692 = shalt.err (!%p689_p12)
}
  0x3d   :  { %s693_s25 = scalar_lea.vmem %s58_s19, 256  ;;  %p698_p0 = scmp.lt.s32.totalorder %s58_s19, %s58_s19 }
  0x3e   :  { %p694_p13 = scmp.ne.s32.totalorder %s58_s19, %s693_s25  ;;  %p699_p1 = scmp.lt.s32.totalorder %s693_s25, %s693_s25 }
  0x40   :  { %p700_p2 = por %p699_p1, %p698_p0 }
  0x42   :  { %p701_p3 = pnand %p700_p2, %p694_p13 }
  0x44   :  { %704 = shalt.err (!%p701_p3)
}
  0x45   :  { %63 = dma.hbm_to_vmem [thread:$0]  %s885_s4, 256, %s58_s19, [#allocation9], %s740_s0, %s740_s0, %s741_s14  }
  0x46   :  { %727 = dma.done.wait [#allocation3], 16  }
  0x47   :  { %728 = vsyncadd [#allocation3], 4294967280 }
  0x48   :  { %729 = dma.done.wait [#allocation6], 384  }
  0x49   :  { %730 = vsyncadd [#allocation6], 4294966912 }
  0x4a   :  { %731 = dma.done.wait [#allocation9], 256  }
  0x4b   :  { %732 = vsyncadd [#allocation9], 4294967040  ;;  %v743_v0 = vmov 0.0   ;;  %vm744_vm0 = vmmov 0   ;;  %v745_v1 = vmov 1966171168   ;;  %v233_v3 = vlaneseq }
  0x4c   :  { %556 = vmatprep.subr.bf16.mxu0 %v743_v0  ;;  %564 = vmatprep.subr.bf16.mxu1 %v743_v0  ;;  %v231_v2 = vunpack.c.l.s4 %v745_v1  ;;  %v593_v4 = vld [vmem:[#allocation8] sm:$0xff]   ;;  %v594_v7 = vld [vmem:[#allocation7] sm:$0xff]   ;;  %v595_v8 = vld [vmem:[#allocation8 + $0x8] sm:$0xff]   ;;  %vm103_vm1 = vcmask 261120   ;;  %v746_v34 = vmov 1983009808  }
  0x4d   :  { %560 = vmatprep.mubr.msk.bf16.mxu0 %vm744_vm0, %v743_v0  ;;  %568 = vmatprep.mubr.msk.bf16.mxu1 %vm744_vm0, %v743_v0  ;;  %v839_v6 = vshrl.u32 %v233_v3, 7  ;;  %v596_v9 = vld [vmem:[#allocation7 + $0x8] sm:$0xff]   ;;  %v86_v10 = vld [vmem:[%s883_s2] sm:$0x1]  ;;  %v210_v11 = vld [vmem:[#allocation5] sm:$0x1]  ;;  %v323_v35 = vunpack.c.l.s4 %v746_v34 }
  0x4e   :  { %v232_v5 = vunpack.c.0.s8 %v231_v2  ;;  %557 = vmatpush3.bf16.msra.mxu0 %v593_v4  ;;  %565 = vmatpush3.bf16.msra.mxu1 %v594_v7  ;;  %v211_v13 = vld [vmem:[#allocation5 + $0x1] sm:$0x1]  ;;  %v212_v14 = vld [vmem:[#allocation5 + $0x2] sm:$0x1]  ;;  %v213_v15 = vld [vmem:[#allocation5 + $0x3] sm:$0x1] }
  0x4f   :  { %558 = vmatprep.subr.bf16.mxu0 %v743_v0  ;;  %566 = vmatprep.subr.bf16.mxu1 %v743_v0  ;;  %v214_v16 = vld [vmem:[#allocation5 + $0x4] sm:$0x1]  ;;  %v215_v17 = vld [vmem:[#allocation5 + $0x5] sm:$0x1]  ;;  %v216_v18 = vld [vmem:[#allocation5 + $0x6] sm:$0x1]  ;;  %v226_v19 = vcombine.low %v210_v11, %v211_v13  ;;  %v227_v20 = vcombine.low %v212_v14, %v213_v15  ;;  %v324_v42 = vunpack.c.0.s8 %v323_v35 }
  0x50   :  { %v235_v12 = vsub.s32 %v232_v5, %v839_v6  ;;  %v81_v21 = vld [vmem:[#allocation2] sm:$0x1]  ;;  %v217_v22 = vld [vmem:[#allocation5 + $0x7] sm:$0x1]  ;;  %v228_v23 = vcombine.low %v214_v16, %v215_v17  ;;  %vm394_vm2 = vcmask 254976   ;;  %v428_v34 = vand.u32 127, %v233_v3 }
  0x51   :  { %v229_v24 = vcombine.low %v216_v18, %v217_v22  ;;  %v327_v46 = vsub.s32 %v324_v42, %v839_v6  ;;  %v544_v47 = vld [vmem:[%s886_s5] ss:$0 sm:$0xff]  ;;  %vm461_vm3 = vcmask 1041409   ;;  %vm463_vm4 = vcmask 1042434  }
  0x52   :  { %559 = vmatpush3.bf16.msra.mxu0 %v595_v8  ;;  %567 = vmatpush3.bf16.msra.mxu1 %v596_v9  ;;  %v236_v25 = vrot.slane %v226_v19, %v235_v12  ;;  %v243_v26 = vrot.slane %v227_v20, %v235_v12  ;;  %v250_v27 = vrot.slane %v228_v23, %v235_v12  ;;  %v546_v9 = vld [vmem:[%s887_s6] ss:$0 sm:$0xff]  ;;  %vm465_vm5 = vcmask 1043459   ;;  %s747_s6 = smov [#allocation10]  }
  0x53   :  { %572 = vmatprep.subr.bf16.mxu0 %v743_v0  ;;  %v257_v28 = vrot.slane %v229_v24, %v235_v12  ;;  %vm467_vm6 = vcmask 1044484   ;;  %vm469_vm7 = vcmask 1045509   ;;  %vm471_vm8 = vcmask 1046534   ;;  %s527_s30 = sshll.u32 %s747_s6, 4  ;;  %s528_s30 = int_to_ptr.vmem [resolvable:$true] %s527_s30 }
  0x54   :  { %v258_v29 = vcombine.low %v236_v25, %v243_v26  ;;  %vm473_vm9 = vcmask 1047559   ;;  %vm508_vm10 = vcmask 58368   ;;  %s705_s8 = scalar_lea.vmem %s528_s30, 32  ;;  %p710_p5 = scmp.lt.s32.totalorder %s528_s30, %s528_s30 }
  0x55   :  { %561 = vmatmul.mubr.msk.bf16.vlgmr.msra.gmra.mrb[0].mxu0 %vm103_vm1, %v86_v10  ;;  %569 = vmatmul.mubr.msk.bf16.vlgmr.msra.gmra.mrb[0].mxu1 %vm103_vm1, %v81_v21  ;;  %v259_v30 = vcombine.low %v250_v27, %v257_v28  ;;  %p706_p4 = scmp.ne.s32.totalorder %s528_s30, %s705_s8  ;;  %p711_p6 = scmp.lt.s32.totalorder %s705_s8, %s705_s8 }
  0x56   :  { %573 = vmatpush3.bf16.msra.mxu0 %v593_v4  ;;  %576 = vmatprep.mubr.msk.bf16.mxu0 %vm744_vm0, %v743_v0  ;;  %v266_v31 = vrot.slane %v258_v29, %v235_v12 }
  0x57   :  { %574 = vmatprep.subr.bf16.mxu0 %v743_v0  ;;  %v273_v32 = vrot.slane %v259_v30, %v235_v12  ;;  %p712_p7 = por %p711_p6, %p710_p5 }
  0x59   :  { %v274_v33 = vcombine.low %v266_v31, %v273_v32  ;;  %p713_p8 = pnand %p712_p7, %p706_p4 }
  0x5a   :  { %575 = vmatpush3.bf16.msra.mxu0 %v595_v8 }
  0x5d   :  { %577 = vmatmul.mubr.msk.bf16.vlgmr.msra.gmra.mrb[4].mxu0 %vm103_vm1, %v274_v33 }
 0x128   :  { %v141_v36 = vpop.f32.mrb[0].mxu0  ;;  %v196_v38 = vpop.f32.mrb[0].mxu1 }
 0x129   :  { %v562_v37 = vpop.f32.mrb[1].mxu0  ;;  %v197_v39 = vadd.f32 %v196_v38, %v141_v36  ;;  %v570_v41 = vpop.f32.mrb[1].mxu1  ;;  %v431_v36 = vsub.s32 %v428_v34, %v839_v6 }
 0x12a   :  { %v144_v40 = vpop.f32.mrb[2].mxu0  ;;  %v199_v44 = vpop.f32.mrb[2].mxu1 }
 0x12b   :  { %v563_v43 = vpop.f32.mrb[3].mxu0  ;;  %v571_v45 = vpop.f32.mrb[3].mxu1  ;;  %v209_v49 = vadd.f32 %v544_v47, %v197_v39 }
 0x130   :  { %v312_v48 = vpop.f32.mrb[4].mxu0 }
 0x131   :  { %v321_v50 = vcombine.high %v312_v48, %v312_v48  ;;  %v328_v51 = vrot.slane %v312_v48, %v327_v46  ;;  %v578_v52 = vpop.f32.mrb[5].mxu0 }
 0x132   :  { %v315_v53 = vpop.f32.mrb[6].mxu0 }
 0x133   :  { %v335_v54 = vrot.slane %v321_v50, %v327_v46  ;;  %v336_v55 = vcombine.high %v328_v51, %v328_v51  ;;  %v363_v56 = vadd.f32 %v328_v51, %v209_v49  ;;  %v338_v57 = vcombine.high %v315_v53, %v315_v53  ;;  %v579_v58 = vpop.f32.mrb[7].mxu0 }
 0x134   :  { %v345_v59 = vrot.slane %v315_v53, %v327_v46 }
 0x135   :  { %v337_v60 = vcombine.high %v335_v54, %v335_v54  ;;  %v364_v61 = vadd.f32 %v336_v55, %v209_v49  ;;  %v365_v62 = vadd.f32 %v335_v54, %v209_v49  ;;  %597 = vtanh.f32 %v363_v56 }
 0x136   :  { %v352_v63 = vrot.slane %v338_v57, %v327_v46  ;;  %v353_v0 = vcombine.high %v345_v59, %v345_v59  ;;  %v367_v1 = vadd.f32 %v345_v59, %v209_v49 }
 0x137   :  { %v366_v2 = vadd.f32 %v337_v60, %v209_v49  ;;  %599 = vtanh.f32 %v364_v61 }
 0x138   :  { %601 = vtanh.f32 %v365_v62  ;;  %v354_v4 = vcombine.high %v352_v63, %v352_v63  ;;  %v368_v5 = vadd.f32 %v353_v0, %v209_v49  ;;  %v369_v7 = vadd.f32 %v352_v63, %v209_v49 }
 0x139   :  { %603 = vtanh.f32 %v366_v2 }
 0x13a   :  { %v370_v8 = vadd.f32 %v354_v4, %v209_v49  ;;  %605 = vtanh.f32 %v367_v1 }
 0x13b   :  { %607 = vtanh.f32 %v368_v5 }
 0x13c   :  { %609 = vtanh.f32 %v369_v7 }
 0x13d   :  { %611 = vtanh.f32 %v370_v8 }
 0x13f   :  { %v598_v10 = vpop.eup %597 }
 0x140   :  { %v386_v11 = vmul.f32 %v598_v10, %v546_v9 }
 0x141   :  { %v600_v12 = vpop.eup %599 }
 0x142   :  { %v602_v13 = vpop.eup %601  ;;  %v395_v14 = vsel %vm394_vm2, %v386_v11, 0.0  ;;  %v387_v15 = vmul.f32 %v600_v12, %v546_v9 }
 0x143   :  { %v604_v16 = vpop.eup %603  ;;  %396 = vadd.xlane.f32.xlu0 %v395_v14  ;;  %v388_v17 = vmul.f32 %v602_v13, %v546_v9 }
 0x144   :  { %v606_v18 = vpop.eup %605  ;;  %v389_v20 = vmul.f32 %v604_v16, %v546_v9  ;;  %v398_v22 = vsel %vm394_vm2, %v387_v15, 0.0 }
 0x145   :  { %v401_v19 = vsel %vm394_vm2, %v388_v17, 0.0  ;;  %v608_v21 = vpop.eup %607  ;;  %v390_v23 = vmul.f32 %v606_v18, %v546_v9 }
 0x146   :  { %402 = vadd.xlane.f32.xlu1 %v401_v19  ;;  %v610_v24 = vpop.eup %609  ;;  %v404_v25 = vsel %vm394_vm2, %v389_v20, 0.0  ;;  %v391_v26 = vmul.f32 %v608_v21, %v546_v9 }
 0x147   :  { %399 = vadd.xlane.f32.xlu0 %v398_v22  ;;  %v612_v27 = vpop.eup %611  ;;  %v407_v28 = vsel %vm394_vm2, %v390_v23, 0.0  ;;  %v392_v29 = vmul.f32 %v610_v24, %v546_v9 }
 0x148   :  { %v410_v30 = vsel %vm394_vm2, %v391_v26, 0.0  ;;  %v393_v31 = vmul.f32 %v612_v27, %v546_v9 }
 0x149   :  { %v413_v32 = vsel %vm394_vm2, %v392_v29, 0.0 }
 0x14a   :  { %405 = vadd.xlane.f32.xlu1 %v404_v25  ;;  %v416_v33 = vsel %vm394_vm2, %v393_v31, 0.0 }
 0x14b   :  { %408 = vadd.xlane.f32.xlu0 %v407_v28 }
 0x14e   :  { %411 = vadd.xlane.f32.xlu1 %v410_v30 }
 0x14f   :  { %414 = vadd.xlane.f32.xlu0 %v413_v32 }
 0x152   :  { %417 = vadd.xlane.f32.xlu1 %v416_v33 }
 0x1d0   :  { %v397_v35 = vpop.xlane.xlu0 %396 }
 0x1d1   :  { %v432_v39 = vrot.slane %v397_v35, %v431_v36 }
 0x1d3   :  { %v403_v37 = vpop.xlane.xlu1 %402 }
 0x1d4   :  { %v400_v38 = vpop.xlane.xlu0 %399  ;;  %v440_v41 = vrot.slane %v403_v37, %v431_v36 }
 0x1d5   :  { %v436_v40 = vrot.slane %v400_v38, %v431_v36 }
 0x1d7   :  { %v462_v42 = vsel %vm461_vm3, %v436_v40, %v432_v39  ;;  %v406_v43 = vpop.xlane.xlu1 %405 }
 0x1d8   :  { %v444_v44 = vrot.slane %v406_v43, %v431_v36  ;;  %v464_v45 = vsel %vm463_vm4, %v440_v41, %v462_v42  ;;  %v409_v46 = vpop.xlane.xlu0 %408 }
 0x1d9   :  { %v448_v47 = vrot.slane %v409_v46, %v431_v36 }
 0x1da   :  { %v466_v48 = vsel %vm465_vm5, %v444_v44, %v464_v45 }
 0x1db   :  { %v468_v3 = vsel %vm467_vm6, %v448_v47, %v466_v48  ;;  %v412_v49 = vpop.xlane.xlu1 %411 }
 0x1dc   :  { %v452_v6 = vrot.slane %v412_v49, %v431_v36  ;;  %v415_v50 = vpop.xlane.xlu0 %414 }
 0x1dd   :  { %v456_v51 = vrot.slane %v415_v50, %v431_v36 }
 0x1de   :  { %v470_v52 = vsel %vm469_vm7, %v452_v6, %v468_v3 }
 0x1df   :  { %v418_v53 = vpop.xlane.xlu1 %417  ;;  %v472_v54 = vsel %vm471_vm8, %v456_v51, %v470_v52 }
 0x1e0   :  { %v460_v55 = vrot.slane %v418_v53, %v431_v36 }
 0x1e2   :  { %v474_v56 = vsel %vm473_vm9, %v460_v55, %v472_v54 }
 0x1e3   :  { %476 = vxpose.xlu0.b32.start.end [1/1] (short) (narrow) %v474_v56, 8 }
 0x263   :  { %v492_v57 = vpop.trf.xlu0 }
 0x264   :  { %v509_v58 = vsel %vm508_vm10, %v492_v57, -inf }
 0x265   :  { %510 = vmax.xlane.f32.xlu1 %v509_v58 }
 0x2f2   :  { %v511_v59 = vpop.xlane.xlu1 %510 }
 0x2f3   :  { %v512_v60 = vsub.f32 %v492_v57, %v511_v59 }
 0x2f5   :  { %v513_v61 = vmul.f32 1.442695, %v512_v60 }
 0x2f7   :  { %613 = vpow2.f32 %v513_v61 }
 0x301   :  { %v614_v62 = vpop.eup %613 }
 0x302   :  { %v515_v63 = vsel %vm508_vm10, %v614_v62, 0.0 }
 0x303   :  { %516 = vadd.xlane.f32.xlu1 %v515_v63 }
 0x390   :  { %v517_v0 = vpop.xlane.xlu1 %516 }
 0x391   :  { %615 = vrcp.f32 %v517_v0 }
 0x39b   :  { %v616_v1 = vpop.eup %615 }
 0x39c   :  { %v519_v2 = vmul.f32 %v616_v1, %v614_v62 }
 0x39e   :  { %520 = vst.msk [vmem:[#allocation10] sm:$0x3] %vm508_vm10, %v519_v2 }
 0x39f   :  { %716 = shalt.err (!%p713_p8)
}
 0x3a0   :  { %s717_s11 = scalar_lea.hbm %s888_s7, 32 }
 0x3a1   :  { %p718_p9 = scmp.ne.s32.totalorder %s888_s7, %s717_s11  ;;  %p721_p10 = scmp.lt.u32.totalorder %s717_s11, %s888_s7 }
 0x3a3   :  { %p723_p11 = pnand %p721_p10, %p718_p9 }
 0x3a5   :  { %726 = shalt.err (!%p723_p11)
}
 0x3a6   :  { %530 = dma.vmem_to_hbm [thread:$0]  %s528_s30, 32, %s888_s7, [#allocation4]  }
 0x3a7   :  { %733 = dma.done.wait [#allocation4], 32  }
 0x3a8   :  { %734 = vsyncadd [#allocation4], 4294967264 }
 0x3a9   :  { %534 = vsyncpa [#allocation3], 1 }
 0x3aa   :  { %535 = vsyncpa [#allocation6], 1 }
 0x3ab   :  { %536 = vsyncpa [#allocation9], 1 }
 0x3ac   :  { %537 = vsyncpa [#allocation4], 1 }

</bundles_post_ra>
